<compile_context>
chip_gen: v6e
topology: v6e:2x2x1
jax: 0.10.0
libtpu: 0.0.40
codegen_flags: <defaults>
</compile_context>

<pallas_src>
import functools

import jax
import jax.numpy as jnp
from jax import lax
from jax.experimental import pallas as pl
from jax.experimental.pallas import tpu as pltpu


def _channel_shuffle_kernel(x_ref, o_ref, *, groups, cpg, fuse, use_loop):
    """x_ref / o_ref: (T_M, C, T_HW) VMEM tiles, C = groups * cpg.

    out[:, i*groups + g, :] = in[:, g*cpg + i, :]
    """
    if groups == 1 or cpg == 1:
        # Identity permutation.
        o_ref[...] = x_ref[...]
        return

    def gather_rows(i):
        # Input rows i, i+cpg, i+2*cpg, ... assembled into a dense
        # (T_M, groups, T_HW) slab.  Only non-strided single-row ref slices.
        return jnp.concatenate(
            [x_ref[:, pl.ds(g * cpg + i, 1), :] for g in range(groups)], axis=1
        )

    if not use_loop:
        # Fully unrolled: static slice starts; each store covers
        # `fuse * groups` contiguous sublanes (>= one vreg of sublanes when
        # possible) so stores stay unmasked / lane-and-sublane dense.
        for i0 in range(0, cpg, fuse):
            hi = min(i0 + fuse, cpg)
            slab = jnp.concatenate([gather_rows(i) for i in range(i0, hi)], axis=1)
            o_ref[:, pl.ds(i0 * groups, (hi - i0) * groups), :] = slab
    else:
        # Very large cpg: visible loop with modest unroll bounds live ranges
        # and compile time while still giving the scheduler ILP.
        def body(i, carry):
            start = pl.multiple_of(i * groups, groups)
            o_ref[:, pl.ds(start, groups), :] = gather_rows(i)
            return carry

        lax.fori_loop(0, cpg, body, 0, unroll=4)


def _vmem_capacity_bytes():
    try:
        return int(pltpu.get_tpu_info().vmem_capacity_bytes)
    except Exception:
        return 64 * 1024 * 1024  # conservative: fits every generation (v7x = 64 MiB)


def _pick_tiles(M, C, HW, itemsize, vmem_bytes):
    """Choose (T_M, T_HW).  4 pipeline buffers (double-buffered input+output)
    must stay well inside VMEM; each grid step should move enough bytes to
    amortize the fixed per-step overhead; keep >= 2 grid steps when M >= 2."""
    footprint_budget = int(vmem_bytes * 0.45)            # for the 4 buffers
    per_buf = max(footprint_budget // 4, 128 * C * itemsize)

    slab_bytes = C * HW * itemsize                        # one batch worth
    max_lanes = max(128, per_buf // (C * itemsize))

    if HW <= max_lanes:
        t_hw = HW                                         # whole spatial slab per step
        t_m_budget = max(1, per_buf // max(slab_bytes, 1))
        t_m_target = max(1, -(-(1 << 20) // max(slab_bytes, 1)))   # ~1 MiB / step
        t_m = min(M, t_m_budget, t_m_target)
        if t_m >= M and M >= 2:
            t_m = (M + 1) // 2                            # >= 2 steps for v7x megacore
        return t_m, t_hw

    # Spatial slab does not fit: tile HW (multiple of 128), one batch per step.
    t = max(128, (max_lanes // 128) * 128)
    if HW % 128 == 0:
        d = t
        while d >= 128:                                   # prefer an even divisor
            if HW % d == 0:
                return 1, d
            d -= 128
    return 1, t                                           # ragged last tile (masked)


def channel_shuffle(x, groups=16):
    """x: (M, C, H, W) NCHW array. Returns channel-shuffled array, same shape."""
    M, C, H, W = x.shape
    assert C % groups == 0, "C must be divisible by groups"
    cpg = C // groups
    HW = H * W
    itemsize = jnp.dtype(x.dtype).itemsize
    x_flat = x.reshape(M, C, HW)

    vmem_bytes = _vmem_capacity_bytes()
    t_m, t_hw = _pick_tiles(M, C, HW, itemsize, vmem_bytes)
    n_m = pl.cdiv(M, t_m)
    n_hw = pl.cdiv(HW, t_hw)

    # Fuse consecutive i so each store covers a full vreg of sublanes
    # (8 rows f32, 16 bf16, 32 int8) even when `groups` is small.
    sublanes_per_vreg = 8 * max(1, 4 // itemsize)
    fuse = min(cpg, max(1, -(-sublanes_per_vreg // groups)))
    use_loop = (cpg // max(fuse, 1)) > 64                 # bound unroll for huge C
    if use_loop:
        fuse = 1

    kernel = functools.partial(
        _channel_shuffle_kernel, groups=groups, cpg=cpg, fuse=fuse, use_loop=use_loop
    )

    tile_bytes = t_m * C * t_hw * itemsize
    vmem_limit = int(min(vmem_bytes, max(32 << 20, 6 * tile_bytes + (8 << 20))))

    out_flat = pl.pallas_call(
        kernel,
        out_shape=jax.ShapeDtypeStruct((M, C, HW), x.dtype),
        grid=(n_m, n_hw),
        in_specs=[pl.BlockSpec((t_m, C, t_hw), lambda m, t: (m, 0, t))],
        out_specs=pl.BlockSpec((t_m, C, t_hw), lambda m, t: (m, 0, t)),
        compiler_params=pltpu.CompilerParams(
            dimension_semantics=("parallel", "parallel"),
            vmem_limit_bytes=vmem_limit,
        ),
        cost_estimate=pl.CostEstimate(
            flops=0,
            transcendentals=0,
            bytes_accessed=int(2 * M * C * HW * itemsize),
        ),
    )(x_flat)

    return out_flat.reshape(M, C, H, W)


def channel_shuffle_ref(x, groups=16):
    """Pure-JAX reference mirroring the PyTorch forward exactly."""
    M, C, H, W = x.shape
    cpg = C // groups
    y = x.reshape(M, groups, cpg, H, W)
    y = jnp.swapaxes(y, 1, 2)
    return y.reshape(M, C, H, W)


if __name__ == "__main__":
    key = jax.random.PRNGKey(0)

    # ChannelShuffle has no learned parameters; `groups` is the only config.
    test_cases = [
        ((2, 32, 16, 16), 16, jnp.float32),   # module default groups, HW lane-aligned
        ((2, 32, 14, 14), 16, jnp.float32),   # non-128-multiple spatial dim (HW = 196)
        ((2, 16, 16, 16), 4, jnp.bfloat16),   # small groups + packed dtype -> fused stores
    ]

    for shape, groups, dtype in test_cases:
        key, sub = jax.random.split(key)
        x = jax.random.normal(sub, shape, dtype=jnp.float32).astype(dtype)

        out = channel_shuffle(x, groups=groups)
        out = jax.block_until_ready(out)

        ref = channel_shuffle_ref(x, groups=groups)
        assert out.shape == shape
        assert out.dtype == x.dtype
        assert jnp.array_equal(out, ref), (
            f"Pallas channel shuffle mismatch vs reference for {shape}, groups={groups}"
        )

    print("KERNEL_OK")
</pallas_src>

<mosaic_0001>
module attributes {stable_mosaic.version = 11 : i64} {
  func.func @_channel_shuffle_kernel(%arg0: i32, %arg1: i32, %arg2: memref<1x32x256xf32, #tpu.memory_space<vmem>>, %arg3: memref<1x32x256xf32, #tpu.memory_space<vmem>>) attributes {dimension_semantics = [#tpu.dimension_semantics<parallel>, #tpu.dimension_semantics<parallel>], iteration_bounds = array<i64: 2, 1>, scalar_prefetch = 0 : i64, scratch_operands = 0 : i64, tpu.core_type = #tpu.core_type<tc>, window_params = [{transform_indices = @transform_0, window_bounds = array<i64: 1, 32, 256>}, {transform_indices = @transform_1, window_bounds = array<i64: 1, 32, 256>}]} {
    %c0 = arith.constant 0 : index
    %c0_0 = arith.constant 0 : index
    %c0_1 = arith.constant 0 : index
    %0 = vector.load %arg2[%c0, %c0_0, %c0_1] : memref<1x32x256xf32, #tpu.memory_space<vmem>>, vector<1x1x256xf32>
    %c0_2 = arith.constant 0 : index
    %c2 = arith.constant 2 : index
    %c0_3 = arith.constant 0 : index
    %1 = vector.load %arg2[%c0_2, %c2, %c0_3] : memref<1x32x256xf32, #tpu.memory_space<vmem>>, vector<1x1x256xf32>
    %c0_4 = arith.constant 0 : index
    %c4 = arith.constant 4 : index
    %c0_5 = arith.constant 0 : index
    %2 = vector.load %arg2[%c0_4, %c4, %c0_5] : memref<1x32x256xf32, #tpu.memory_space<vmem>>, vector<1x1x256xf32>
    %c0_6 = arith.constant 0 : index
    %c6 = arith.constant 6 : index
    %c0_7 = arith.constant 0 : index
    %3 = vector.load %arg2[%c0_6, %c6, %c0_7] : memref<1x32x256xf32, #tpu.memory_space<vmem>>, vector<1x1x256xf32>
    %c0_8 = arith.constant 0 : index
    %c8 = arith.constant 8 : index
    %c0_9 = arith.constant 0 : index
    %4 = vector.load %arg2[%c0_8, %c8, %c0_9] : memref<1x32x256xf32, #tpu.memory_space<vmem>>, vector<1x1x256xf32>
    %c0_10 = arith.constant 0 : index
    %c10 = arith.constant 10 : index
    %c0_11 = arith.constant 0 : index
    %5 = vector.load %arg2[%c0_10, %c10, %c0_11] : memref<1x32x256xf32, #tpu.memory_space<vmem>>, vector<1x1x256xf32>
    %c0_12 = arith.constant 0 : index
    %c12 = arith.constant 12 : index
    %c0_13 = arith.constant 0 : index
    %6 = vector.load %arg2[%c0_12, %c12, %c0_13] : memref<1x32x256xf32, #tpu.memory_space<vmem>>, vector<1x1x256xf32>
    %c0_14 = arith.constant 0 : index
    %c14 = arith.constant 14 : index
    %c0_15 = arith.constant 0 : index
    %7 = vector.load %arg2[%c0_14, %c14, %c0_15] : memref<1x32x256xf32, #tpu.memory_space<vmem>>, vector<1x1x256xf32>
    %c0_16 = arith.constant 0 : index
    %c16 = arith.constant 16 : index
    %c0_17 = arith.constant 0 : index
    %8 = vector.load %arg2[%c0_16, %c16, %c0_17] : memref<1x32x256xf32, #tpu.memory_space<vmem>>, vector<1x1x256xf32>
    %c0_18 = arith.constant 0 : index
    %c18 = arith.constant 18 : index
    %c0_19 = arith.constant 0 : index
    %9 = vector.load %arg2[%c0_18, %c18, %c0_19] : memref<1x32x256xf32, #tpu.memory_space<vmem>>, vector<1x1x256xf32>
    %c0_20 = arith.constant 0 : index
    %c20 = arith.constant 20 : index
    %c0_21 = arith.constant 0 : index
    %10 = vector.load %arg2[%c0_20, %c20, %c0_21] : memref<1x32x256xf32, #tpu.memory_space<vmem>>, vector<1x1x256xf32>
    %c0_22 = arith.constant 0 : index
    %c22 = arith.constant 22 : index
    %c0_23 = arith.constant 0 : index
    %11 = vector.load %arg2[%c0_22, %c22, %c0_23] : memref<1x32x256xf32, #tpu.memory_space<vmem>>, vector<1x1x256xf32>
    %c0_24 = arith.constant 0 : index
    %c24 = arith.constant 24 : index
    %c0_25 = arith.constant 0 : index
    %12 = vector.load %arg2[%c0_24, %c24, %c0_25] : memref<1x32x256xf32, #tpu.memory_space<vmem>>, vector<1x1x256xf32>
    %c0_26 = arith.constant 0 : index
    %c26 = arith.constant 26 : index
    %c0_27 = arith.constant 0 : index
    %13 = vector.load %arg2[%c0_26, %c26, %c0_27] : memref<1x32x256xf32, #tpu.memory_space<vmem>>, vector<1x1x256xf32>
    %c0_28 = arith.constant 0 : index
    %c28 = arith.constant 28 : index
    %c0_29 = arith.constant 0 : index
    %14 = vector.load %arg2[%c0_28, %c28, %c0_29] : memref<1x32x256xf32, #tpu.memory_space<vmem>>, vector<1x1x256xf32>
    %c0_30 = arith.constant 0 : index
    %c30 = arith.constant 30 : index
    %c0_31 = arith.constant 0 : index
    %15 = vector.load %arg2[%c0_30, %c30, %c0_31] : memref<1x32x256xf32, #tpu.memory_space<vmem>>, vector<1x1x256xf32>
    %16 = tpu.concatenate %0, %1, %2, %3, %4, %5, %6, %7, %8, %9, %10, %11, %12, %13, %14, %15 in 1 : vector<1x1x256xf32>, vector<1x1x256xf32>, vector<1x1x256xf32>, vector<1x1x256xf32>, vector<1x1x256xf32>, vector<1x1x256xf32>, vector<1x1x256xf32>, vector<1x1x256xf32>, vector<1x1x256xf32>, vector<1x1x256xf32>, vector<1x1x256xf32>, vector<1x1x256xf32>, vector<1x1x256xf32>, vector<1x1x256xf32>, vector<1x1x256xf32>, vector<1x1x256xf32> -> vector<1x16x256xf32>
    %c0_32 = arith.constant 0 : index
    %c0_33 = arith.constant 0 : index
    %c0_34 = arith.constant 0 : index
    %17 = vector.load %arg3[%c0_32, %c0_33, %c0_34] : memref<1x32x256xf32, #tpu.memory_space<vmem>>, vector<1x16x256xf32>
    tpu.vector_store %arg3[%c0_32, %c0_33, %c0_34], %16 {strides = array<i32>} : memref<1x32x256xf32, #tpu.memory_space<vmem>>, vector<1x16x256xf32>,
    %c0_35 = arith.constant 0 : index
    %c1 = arith.constant 1 : index
    %c0_36 = arith.constant 0 : index
    %18 = vector.load %arg2[%c0_35, %c1, %c0_36] : memref<1x32x256xf32, #tpu.memory_space<vmem>>, vector<1x1x256xf32>
    %c0_37 = arith.constant 0 : index
    %c3 = arith.constant 3 : index
    %c0_38 = arith.constant 0 : index
    %19 = vector.load %arg2[%c0_37, %c3, %c0_38] : memref<1x32x256xf32, #tpu.memory_space<vmem>>, vector<1x1x256xf32>
    %c0_39 = arith.constant 0 : index
    %c5 = arith.constant 5 : index
    %c0_40 = arith.constant 0 : index
    %20 = vector.load %arg2[%c0_39, %c5, %c0_40] : memref<1x32x256xf32, #tpu.memory_space<vmem>>, vector<1x1x256xf32>
    %c0_41 = arith.constant 0 : index
    %c7 = arith.constant 7 : index
    %c0_42 = arith.constant 0 : index
    %21 = vector.load %arg2[%c0_41, %c7, %c0_42] : memref<1x32x256xf32, #tpu.memory_space<vmem>>, vector<1x1x256xf32>
    %c0_43 = arith.constant 0 : index
    %c9 = arith.constant 9 : index
    %c0_44 = arith.constant 0 : index
    %22 = vector.load %arg2[%c0_43, %c9, %c0_44] : memref<1x32x256xf32, #tpu.memory_space<vmem>>, vector<1x1x256xf32>
    %c0_45 = arith.constant 0 : index
    %c11 = arith.constant 11 : index
    %c0_46 = arith.constant 0 : index
    %23 = vector.load %arg2[%c0_45, %c11, %c0_46] : memref<1x32x256xf32, #tpu.memory_space<vmem>>, vector<1x1x256xf32>
    %c0_47 = arith.constant 0 : index
    %c13 = arith.constant 13 : index
    %c0_48 = arith.constant 0 : index
    %24 = vector.load %arg2[%c0_47, %c13, %c0_48] : memref<1x32x256xf32, #tpu.memory_space<vmem>>, vector<1x1x256xf32>
    %c0_49 = arith.constant 0 : index
    %c15 = arith.constant 15 : index
    %c0_50 = arith.constant 0 : index
    %25 = vector.load %arg2[%c0_49, %c15, %c0_50] : memref<1x32x256xf32, #tpu.memory_space<vmem>>, vector<1x1x256xf32>
    %c0_51 = arith.constant 0 : index
    %c17 = arith.constant 17 : index
    %c0_52 = arith.constant 0 : index
    %26 = vector.load %arg2[%c0_51, %c17, %c0_52] : memref<1x32x256xf32, #tpu.memory_space<vmem>>, vector<1x1x256xf32>
    %c0_53 = arith.constant 0 : index
    %c19 = arith.constant 19 : index
    %c0_54 = arith.constant 0 : index
    %27 = vector.load %arg2[%c0_53, %c19, %c0_54] : memref<1x32x256xf32, #tpu.memory_space<vmem>>, vector<1x1x256xf32>
    %c0_55 = arith.constant 0 : index
    %c21 = arith.constant 21 : index
    %c0_56 = arith.constant 0 : index
    %28 = vector.load %arg2[%c0_55, %c21, %c0_56] : memref<1x32x256xf32, #tpu.memory_space<vmem>>, vector<1x1x256xf32>
    %c0_57 = arith.constant 0 : index
    %c23 = arith.constant 23 : index
    %c0_58 = arith.constant 0 : index
    %29 = vector.load %arg2[%c0_57, %c23, %c0_58] : memref<1x32x256xf32, #tpu.memory_space<vmem>>, vector<1x1x256xf32>
    %c0_59 = arith.constant 0 : index
    %c25 = arith.constant 25 : index
    %c0_60 = arith.constant 0 : index
    %30 = vector.load %arg2[%c0_59, %c25, %c0_60] : memref<1x32x256xf32, #tpu.memory_space<vmem>>, vector<1x1x256xf32>
    %c0_61 = arith.constant 0 : index
    %c27 = arith.constant 27 : index
    %c0_62 = arith.constant 0 : index
    %31 = vector.load %arg2[%c0_61, %c27, %c0_62] : memref<1x32x256xf32, #tpu.memory_space<vmem>>, vector<1x1x256xf32>
    %c0_63 = arith.constant 0 : index
    %c29 = arith.constant 29 : index
    %c0_64 = arith.constant 0 : index
    %32 = vector.load %arg2[%c0_63, %c29, %c0_64] : memref<1x32x256xf32, #tpu.memory_space<vmem>>, vector<1x1x256xf32>
    %c0_65 = arith.constant 0 : index
    %c31 = arith.constant 31 : index
    %c0_66 = arith.constant 0 : index
    %33 = vector.load %arg2[%c0_65, %c31, %c0_66] : memref<1x32x256xf32, #tpu.memory_space<vmem>>, vector<1x1x256xf32>
    %34 = tpu.concatenate %18, %19, %20, %21, %22, %23, %24, %25, %26, %27, %28, %29, %30, %31, %32, %33 in 1 : vector<1x1x256xf32>, vector<1x1x256xf32>, vector<1x1x256xf32>, vector<1x1x256xf32>, vector<1x1x256xf32>, vector<1x1x256xf32>, vector<1x1x256xf32>, vector<1x1x256xf32>, vector<1x1x256xf32>, vector<1x1x256xf32>, vector<1x1x256xf32>, vector<1x1x256xf32>, vector<1x1x256xf32>, vector<1x1x256xf32>, vector<1x1x256xf32>, vector<1x1x256xf32> -> vector<1x16x256xf32>
    %c0_67 = arith.constant 0 : index
    %c16_68 = arith.constant 16 : index
    %c0_69 = arith.constant 0 : index
    %35 = vector.load %arg3[%c0_67, %c16_68, %c0_69] : memref<1x32x256xf32, #tpu.memory_space<vmem>>, vector<1x16x256xf32>
    tpu.vector_store %arg3[%c0_67, %c16_68, %c0_69], %34 {strides = array<i32>} : memref<1x32x256xf32, #tpu.memory_space<vmem>>, vector<1x16x256xf32>,
    return
  }
  func.func @transform_0(%arg0: i32, %arg1: i32) -> (i32, i32, i32) {
    %c0_i32 = arith.constant 0 : i32
    %c0_i32_0 = arith.constant 0 : i32
    return %arg0, %c0_i32, %arg1 : i32, i32, i32
  }
  func.func @transform_1(%arg0: i32, %arg1: i32) -> (i32, i32, i32) {
    %c0_i32 = arith.constant 0 : i32
    %c0_i32_0 = arith.constant 0 : i32
    return %arg0, %c0_i32, %arg1 : i32, i32, i32
  }
}

</mosaic_0001>

<bundles_post_ra>
// kernel: tpu_custom_call.1
= control target key start
LH: loop header
LB: loop body
LE: loop exit
PB: predicated region body
PF: predicated region fallthrough
CT: control target
= control target key end

     0   :  { %6 = vsyncpa [#allocation3], 0  ;;  %s1315_s0 = inlined_call_operand.hbm [shape: f32[2,32,256], index: 0, kind: input, shape index: {}]   ;;  %s1316_s1 = inlined_call_operand.hbm [shape: f32[2,32,256], index: 1, kind: output, shape index: {}]  }
   0x1   :  { %8 = vsyncpa [#allocation3 + $0x1], 0 }
   0x2   :  { %9 = vsyncpa [#allocation4], 0 }
   0x3   :  { %11 = vsyncpa [#allocation4 + $0x1], 0  ;;  %s984_s6 = smov 0   ;;  %s986_s7 = smov 0  }
   0x4   :  { %s988_s8 = smov 0   ;;  %s990_s9 = smov 0  }
   0x5   :  { %s992_s10 = smov 0   ;;  %s994_s11 = smov 0  }
   0x6 LB: > { %s744_s12 = sadd.s32 4294967295, %s966_s11   ;;  %s745_s13 = sadd.s32 4294967294, %s966_s11   ;;  %s966_s11 = sphi %s994_s11, %s17_s11   ;;  %s962_s10 = sphi %s992_s10, %s1327_s10   ;;  %s958_s9 = sphi %s990_s9, %s1326_s9   ;;  %s954_s8 = sphi %s988_s8, %s1325_s8   ;;  %s950_s7 = sphi %s986_s7, %s1324_s7   ;;  %s946_s6 = sphi %s984_s6, %s1323_s6  }
   0x7   : > { %s29_s14 = sadd.s32 1, %s962_s10  ;;  %s38_s15 = sadd.s32 1, %s954_s8 }
   0x8   : > { %p31_p0 = scmp.ge.s32.totalorder %s29_s14, 2  ;;  %p45_p1 = scmp.ne.s32.totalorder %s954_s8, %s950_s7 }
   0x9   : > { %p46_p2 = scmp.eq.s32.totalorder %s966_s11, 0  ;;  %p51_p3 = scmp.ne.s32.totalorder %s950_s7, %s946_s6 }
   0xa   : > { %s1329_s14 = smov (%p31_p0, %s29_s14), 0  ;;  %p52_p5 = scmp.eq.s32.totalorder %s744_s12, 0 }
   0xb   : > { %p1025_p4 = por %p46_p2, %p45_p1  ;;  %s33_s17 = ssub.s32 %s962_s10, %s1329_s14 }
   0xc   : > { %p77_p6 = scmp.eq.s32.totalorder %s744_s12, 1  ;;  %p36_p7 = scmp.eq.s32.totalorder %s33_s17, 0 }
   0xd   : > { %p1031_p8 = por %p52_p5, %p51_p3  ;;  %p83_p10 = scmp.eq.s32.totalorder %s745_s13, 1 }
   0xe   : > { %p1035_p9 = por %p77_p6, %p45_p1  ;;  %p804_p13 = scmp.lt.s32.totalorder %s966_s11, 2 }
   0xf   : > { %s1040_s20 = scalar_select %p36_p7, %s954_s8, %s38_s15  }
  0x10   : > { %p1042_p11 = por %p83_p10, %p51_p3  ;;  %s103_s22 = sand.u32 1, %s954_s8  }
  0x11   : > { %s748_s23 = sshll.u32 %s103_s22, 6  ;;  %s790_s24 = sshll.u32 %s962_s10, 10 }
  0x12   : > { %s115_s27 = scalar_lea.hbm %s1315_s0, %s790_s24  ;;  %s107_s28 = scalar_lea.vmem [#allocation2], %s748_s23 }
  0x13   : > { %s116_s29 = sshll.u32 %s107_s28, 4  ;;  %p1055_p0 = pnand %p804_p13, %p1025_p4  ;;  %s117_s29 = int_to_ptr.vmem [resolvable:$true] %s116_s29 }
  0x14   : > { %p751_p1 = scmp.ge.s32.totalorder %s966_s11, 1  ;;  %s104_s2 = scalar_lea.sflag [#allocation3], %s103_s22 }
  0x15   : > { %p860_p2 = pneg %p1055_p0  ;;  %s871_s3 = scalar_lea.vmem %s117_s29, 1024 }
  0x16   : > { %p872_p3 = scmp.ne.s32.totalorder %s117_s29, %s871_s3  ;;  %s968_s4 = smov [#allocation2]  }
  0x17   : > { %s876_s5 = sshll.u32 %s968_s4, 4  ;;  %s877_s5 = int_to_ptr.vmem [resolvable:$false] %s876_s5 }
  0x18   : > { %p874_p5 = pnand %p872_p3, %p860_p2  ;;  %s878_s12 = scalar_lea.vmem %s877_s5, 2048 }
  0x19   : > { %p879_p7 = scmp.lt.s32.totalorder %s117_s29, %s877_s5  ;;  %p880_p10 = scmp.lt.s32.totalorder %s878_s12, %s871_s3 }
  0x1a   : > { %p875_p6 = pneg %p874_p5 }
  0x1b   : > { %p881_p12 = por %p880_p10, %p879_p7 }
  0x1d   : > { %p882_p4 = pnand %p881_p12, %p875_p6 }
  0x1f   : > { %885 = shalt.err (!%p882_p4)
}
  0x20   : > { %s969_s13 = smov 256   ;;  %s970_s15 = smov 16  }
  0x21   : > { %799 = dma.hbm_to_vmem [thread:$0]  (!%p1055_p0), %s115_s27, 1024, %s117_s29, %s104_s2, %s969_s13, %s969_s13, %s970_s15  }
  0x22   : > { %p124_p13 = scmp.lt.s32.totalorder %s966_s11, 3 }
  0x24   : > { %p125_p2 = pnand %p751_p1, %p124_p13 }
  0x25   : > { %s1068_s16 = sand.u32 (!%p125_p2), 1, %s950_s7  }
  0x26   : > { %128 = sbr.rel (%p125_p2) target bundleno = 98 (0x62), region = 24  ;;  %s752_s17 = sshll.u32 (!%p125_p2), %s1068_s16, 6 }
  0x27   : > { %s131_s22 = scalar_lea.sflag (!%p125_p2), [#allocation3], %s1068_s16  ;;  %s1074_s23 = scalar_lea.vmem (!%p125_p2), [#allocation2], %s752_s17 }
  0x2b   : > { %937 = dma.done.wait (%p1031_p8), %s131_s22, 1024  }
  0x2c   : > { %939 = vsyncadd (%p1031_p8), %s131_s22, 4294966272  ;;  %v187_v0 = vlaneseq  ;;  %vm362_vm0 = vcmask 1040384   ;;  %vm365_vm1 = vcmask 1041408   ;;  %vm368_vm2 = vcmask 1042432   ;;  %s1141_s18 = scalar_lea.vmem [#allocation5], %s752_s17  ;;  %s791_s25 = sshll.u32 %s958_s9, 10 }
  0x2d   : > { %vm371_vm3 = vcmask 1043456   ;;  %vm374_vm4 = vcmask 1044480   ;;  %vm377_vm5 = vcmask 1045504   ;;  %vm380_vm6 = vcmask 1046528   ;;  %s657_s24 = sshll.u32 %s1141_s18, 4  ;;  %s1264_s9 = scalar_lea.hbm %s1316_s1, %s791_s25  ;;  %s1258_s24 = int_to_ptr.vmem [resolvable:$true] %s657_s24 }
  0x2e   : > { %v188_v1 = vshrl.u32 %v187_v0, 7  ;;  %v155_v4 = vld [vmem:[%s1074_s23] ss:$8 sm:$0x3]  ;;  %s642_s28 = scalar_lea.sflag [#allocation4], %s1068_s16  ;;  %s886_s29 = scalar_lea.vmem %s1258_s24, 1024 }
  0x2f   : > { %v754_v5 = vld [vmem:[%s1074_s23 + $0x2] ss:$8 sm:$0x3]  ;;  %v755_v6 = vld [vmem:[%s1074_s23 + $0x4] ss:$8 sm:$0x3]  ;;  %p887_p8 = scmp.ne.s32.totalorder %s1258_s24, %s886_s29 }
  0x30   : > { %v1080_v2 = vsub.s32 0, %v188_v1  ;;  %v1082_v3 = vsub.s32 1, %v188_v1  ;;  %v756_v7 = vld [vmem:[%s1074_s23 + $0x6] ss:$8 sm:$0x3]  ;;  %s971_s30 = smov [#allocation5]  }
  0x31   : > { %v757_v12 = vld [vmem:[%s1074_s23 + $0x10] ss:$8 sm:$0x3]  ;;  %v758_v13 = vld [vmem:[%s1074_s23 + $0x12] ss:$8 sm:$0x3]  ;;  %p888_p12 = pnand %p887_p8, %p1035_p9 }
  0x32   : > { %v190_v8 = vrot.slane %v155_v4, %v1080_v2  ;;  %v201_v9 = vrot.slane %v754_v5, %v1080_v2  ;;  %v194_v10 = vrot.slane %v155_v4, %v1082_v3  ;;  %v205_v11 = vrot.slane %v754_v5, %v1082_v3  ;;  %v759_v18 = vld [vmem:[%s1074_s23 + $0x14] ss:$8 sm:$0x3]  ;;  %v760_v19 = vld [vmem:[%s1074_s23 + $0x16] ss:$8 sm:$0x3] }
  0x33   : > { %v212_v14 = vrot.slane %v755_v6, %v1080_v2  ;;  %v223_v15 = vrot.slane %v756_v7, %v1080_v2  ;;  %v216_v16 = vrot.slane %v755_v6, %v1082_v3  ;;  %v227_v17 = vrot.slane %v756_v7, %v1082_v3  ;;  %v761_v28 = vld [vmem:[%s1074_s23 + $0x20] ss:$8 sm:$0x3]  ;;  %v762_v29 = vld [vmem:[%s1074_s23 + $0x22] ss:$8 sm:$0x3]  ;;  %p889_p0 = pneg %p888_p12 }
  0x34   : > { %v234_v20 = vrot.slane %v757_v12, %v1080_v2  ;;  %v245_v21 = vrot.slane %v758_v13, %v1080_v2  ;;  %v363_v22 = vsel %vm362_vm0, %v190_v8, %v201_v9  ;;  %v238_v23 = vrot.slane %v757_v12, %v1082_v3  ;;  %v763_v34 = vld [vmem:[%s1074_s23 + $0x24] ss:$8 sm:$0x3]  ;;  %v764_v35 = vld [vmem:[%s1074_s23 + $0x26] ss:$8 sm:$0x3] }
  0x35   : > { %v256_v24 = vrot.slane %v759_v18, %v1080_v2  ;;  %v267_v25 = vrot.slane %v760_v19, %v1080_v2  ;;  %v366_v26 = vsel %vm365_vm1, %v363_v22, %v212_v14  ;;  %v249_v27 = vrot.slane %v758_v13, %v1082_v3  ;;  %v765_v38 = vld [vmem:[%s1074_s23 + $0x30] ss:$8 sm:$0x3]  ;;  %v766_v39 = vld [vmem:[%s1074_s23 + $0x32] ss:$8 sm:$0x3] }
  0x36   : > { %v369_v30 = vsel %vm368_vm2, %v366_v26, %v223_v15  ;;  %v260_v31 = vrot.slane %v759_v18, %v1082_v3  ;;  %v271_v32 = vrot.slane %v760_v19, %v1082_v3  ;;  %v364_v33 = vsel %vm362_vm0, %v194_v10, %v205_v11  ;;  %v767_v44 = vld [vmem:[%s1074_s23 + $0x34] ss:$8 sm:$0x3]  ;;  %v1126_v45 = vld [vmem:[%s1074_s23 + $0x36] ss:$8 sm:$0x3] }
  0x37   : > { %v372_v36 = vsel %vm371_vm3, %v369_v30, %v234_v20  ;;  %v367_v37 = vsel %vm365_vm1, %v364_v33, %v216_v16  ;;  %v278_v40 = vrot.slane %v761_v28, %v1080_v2  ;;  %v289_v41 = vrot.slane %v762_v29, %v1080_v2  ;;  %v769_v60 = vld [vmem:[%s1074_s23 + $0x1] ss:$8 sm:$0x3]  ;;  %v770_v1 = vld [vmem:[%s1074_s23 + $0x3] ss:$8 sm:$0x3] }
  0x38   : > { %v375_v42 = vsel %vm374_vm4, %v372_v36, %v245_v21  ;;  %v370_v43 = vsel %vm368_vm2, %v367_v37, %v227_v17  ;;  %v300_v46 = vrot.slane %v763_v34, %v1080_v2  ;;  %v311_v47 = vrot.slane %v764_v35, %v1080_v2  ;;  %v771_v4 = vld [vmem:[%s1074_s23 + $0x5] ss:$8 sm:$0x3]  ;;  %v772_v9 = vld [vmem:[%s1074_s23 + $0x7] ss:$8 sm:$0x3] }
  0x39   : > { %v378_v48 = vsel %vm377_vm5, %v375_v42, %v256_v24  ;;  %v373_v49 = vsel %vm371_vm3, %v370_v43, %v238_v23  ;;  %v322_v50 = vrot.slane %v765_v38, %v1080_v2  ;;  %v333_v51 = vrot.slane %v766_v39, %v1080_v2  ;;  %v773_v10 = vld [vmem:[%s1074_s23 + $0x11] ss:$8 sm:$0x3]  ;;  %v774_v14 = vld [vmem:[%s1074_s23 + $0x13] ss:$8 sm:$0x3] }
  0x3a   : > { %v381_v52 = vsel %vm380_vm6, %v378_v48, %v267_v25  ;;  %v376_v53 = vsel %vm374_vm4, %v373_v49, %v249_v27  ;;  %v344_v54 = vrot.slane %v767_v44, %v1080_v2  ;;  %v355_v55 = vrot.slane %v1126_v45, %v1080_v2  ;;  %v1168_v15 = vld [vmem:[%s1074_s23 + $0x15] ss:$8 sm:$0x3]  ;;  %v1174_v19 = vld [vmem:[%s1074_s23 + $0x17] ss:$8 sm:$0x3] }
  0x3b   : > { %397 = vst [vmem:[%s1141_s18] sm:$0xff] %v381_v52  ;;  %v379_v56 = vsel %vm377_vm5, %v376_v53, %v260_v31  ;;  %v383_v57 = vsel %vm362_vm0, %v278_v40, %v289_v41  ;;  %v282_v58 = vrot.slane %v761_v28, %v1082_v3  ;;  %v293_v59 = vrot.slane %v762_v29, %v1082_v3  ;;  %s890_s2 = sshll.u32 %s971_s30, 4  ;;  %s891_s2 = int_to_ptr.vmem [resolvable:$false] %s890_s2 }
  0x3c   : > { %v382_v61 = vsel %vm380_vm6, %v379_v56, %v271_v32  ;;  %v385_v62 = vsel %vm365_vm1, %v383_v57, %v300_v46  ;;  %v304_v63 = vrot.slane %v763_v34, %v1082_v3  ;;  %v315_v0 = vrot.slane %v764_v35, %v1082_v3  ;;  %s892_s3 = scalar_lea.vmem %s891_s2, 2048  ;;  %p893_p1 = scmp.lt.s32.totalorder %s1258_s24, %s891_s2 }
  0x3d   : > { %398 = vst [vmem:[%s1141_s18 + $0x8] sm:$0xff] %v382_v61  ;;  %v387_v5 = vsel %vm368_vm2, %v385_v62, %v311_v47  ;;  %v326_v6 = vrot.slane %v765_v38, %v1082_v3  ;;  %v337_v7 = vrot.slane %v766_v39, %v1082_v3  ;;  %v348_v8 = vrot.slane %v767_v44, %v1082_v3  ;;  %v777_v38 = vld [vmem:[%s1074_s23 + $0x21] ss:$8 sm:$0x3]  ;;  %p894_p3 = scmp.lt.s32.totalorder %s892_s3, %s886_s29 }
  0x3e   : > { %v389_v11 = vsel %vm371_vm3, %v387_v5, %v322_v50  ;;  %v359_v12 = vrot.slane %v1126_v45, %v1082_v3  ;;  %v384_v13 = vsel %vm362_vm0, %v282_v58, %v293_v59  ;;  %v437_v16 = vrot.slane %v769_v60, %v1080_v2  ;;  %v778_v39 = vld [vmem:[%s1074_s23 + $0x23] ss:$8 sm:$0x3]  ;;  %v779_v44 = vld [vmem:[%s1074_s23 + $0x25] ss:$8 sm:$0x3] }
  0x3f   : > { %v391_v17 = vsel %vm374_vm4, %v389_v11, %v333_v51  ;;  %v386_v18 = vsel %vm365_vm1, %v384_v13, %v304_v63  ;;  %v448_v20 = vrot.slane %v770_v1, %v1080_v2  ;;  %v459_v21 = vrot.slane %v771_v4, %v1080_v2  ;;  %v780_v45 = vld [vmem:[%s1074_s23 + $0x27] ss:$8 sm:$0x3]  ;;  %v781_v50 = vld [vmem:[%s1074_s23 + $0x31] ss:$8 sm:$0x3]  ;;  %p895_p5 = por %p894_p3, %p893_p1 }
  0x40   : > { %v393_v22 = vsel %vm377_vm5, %v391_v17, %v344_v54  ;;  %v388_v23 = vsel %vm368_vm2, %v386_v18, %v315_v0  ;;  %v470_v24 = vrot.slane %v772_v9, %v1080_v2  ;;  %v481_v25 = vrot.slane %v773_v10, %v1080_v2  ;;  %v782_v51 = vld [vmem:[%s1074_s23 + $0x33] ss:$8 sm:$0x3]  ;;  %v783_v54 = vld [vmem:[%s1074_s23 + $0x35] ss:$8 sm:$0x3] }
  0x41   : > { %v395_v26 = vsel %vm380_vm6, %v393_v22, %v355_v55  ;;  %v390_v27 = vsel %vm371_vm3, %v388_v23, %v326_v6  ;;  %v492_v28 = vrot.slane %v774_v14, %v1080_v2  ;;  %v503_v29 = vrot.slane %v1168_v15, %v1080_v2  ;;  %v784_v55 = vld [vmem:[%s1074_s23 + $0x37] ss:$8 sm:$0x3]  ;;  %p896_p6 = pnand %p895_p5, %p889_p0 }
  0x42   : > { %399 = vst [vmem:[%s1141_s18 + $0x10] sm:$0xff] %v395_v26  ;;  %v392_v30 = vsel %vm374_vm4, %v390_v27, %v337_v7  ;;  %v514_v31 = vrot.slane %v1174_v19, %v1080_v2  ;;  %v609_v32 = vsel %vm362_vm0, %v437_v16, %v448_v20  ;;  %v441_v33 = vrot.slane %v769_v60, %v1082_v3 }
  0x43   : > { %v394_v34 = vsel %vm377_vm5, %v392_v30, %v348_v8  ;;  %v611_v35 = vsel %vm365_vm1, %v609_v32, %v459_v21  ;;  %v452_v36 = vrot.slane %v770_v1, %v1082_v3  ;;  %v463_v37 = vrot.slane %v771_v4, %v1082_v3 }
  0x44   : > { %v396_v40 = vsel %vm380_vm6, %v394_v34, %v359_v12  ;;  %v613_v41 = vsel %vm368_vm2, %v611_v35, %v470_v24  ;;  %v474_v42 = vrot.slane %v772_v9, %v1082_v3  ;;  %v485_v43 = vrot.slane %v773_v10, %v1082_v3 }
  0x45   : > { %400 = vst [vmem:[%s1141_s18 + $0x18] sm:$0xff] %v396_v40  ;;  %v615_v46 = vsel %vm371_vm3, %v613_v41, %v481_v25  ;;  %v496_v47 = vrot.slane %v774_v14, %v1082_v3  ;;  %v507_v48 = vrot.slane %v1168_v15, %v1082_v3  ;;  %v518_v49 = vrot.slane %v1174_v19, %v1082_v3 }
  0x46   : > { %v617_v52 = vsel %vm374_vm4, %v615_v46, %v492_v28  ;;  %v610_v53 = vsel %vm362_vm0, %v441_v33, %v452_v36  ;;  %v525_v56 = vrot.slane %v777_v38, %v1080_v2  ;;  %v536_v57 = vrot.slane %v778_v39, %v1080_v2 }
  0x47   : > { %v619_v58 = vsel %vm377_vm5, %v617_v52, %v503_v29  ;;  %v612_v59 = vsel %vm365_vm1, %v610_v53, %v463_v37  ;;  %v547_v60 = vrot.slane %v779_v44, %v1080_v2  ;;  %v558_v61 = vrot.slane %v780_v45, %v1080_v2 }
  0x48   : > { %v621_v62 = vsel %vm380_vm6, %v619_v58, %v514_v31  ;;  %v614_v63 = vsel %vm368_vm2, %v612_v59, %v474_v42  ;;  %v569_v0 = vrot.slane %v781_v50, %v1080_v2  ;;  %v580_v1 = vrot.slane %v782_v51, %v1080_v2 }
  0x49   : > { %637 = vst [vmem:[%s1141_s18 + $0x20] sm:$0xff] %v621_v62  ;;  %v616_v4 = vsel %vm371_vm3, %v614_v63, %v485_v43  ;;  %v591_v5 = vrot.slane %v783_v54, %v1080_v2  ;;  %v602_v6 = vrot.slane %v784_v55, %v1080_v2  ;;  %v623_v7 = vsel %vm362_vm0, %v525_v56, %v536_v57 }
  0x4a   : > { %v618_v8 = vsel %vm374_vm4, %v616_v4, %v496_v47  ;;  %v625_v9 = vsel %vm365_vm1, %v623_v7, %v547_v60  ;;  %v529_v10 = vrot.slane %v777_v38, %v1082_v3  ;;  %v540_v11 = vrot.slane %v778_v39, %v1082_v3 }
  0x4b   : > { %v620_v12 = vsel %vm377_vm5, %v618_v8, %v507_v48  ;;  %v627_v13 = vsel %vm368_vm2, %v625_v9, %v558_v61  ;;  %v551_v14 = vrot.slane %v779_v44, %v1082_v3  ;;  %v562_v2 = vrot.slane %v780_v45, %v1082_v3 }
  0x4c   : > { %v622_v15 = vsel %vm380_vm6, %v620_v12, %v518_v49  ;;  %v629_v16 = vsel %vm371_vm3, %v627_v13, %v569_v0  ;;  %v573_v17 = vrot.slane %v781_v50, %v1082_v3  ;;  %v584_v19 = vrot.slane %v782_v51, %v1082_v3 }
  0x4d   : > { %638 = vst [vmem:[%s1141_s18 + $0x28] sm:$0xff] %v622_v15  ;;  %v631_v18 = vsel %vm374_vm4, %v629_v16, %v580_v1  ;;  %v624_v20 = vsel %vm362_vm0, %v529_v10, %v540_v11  ;;  %v595_v22 = vrot.slane %v783_v54, %v1082_v3  ;;  %v606_v25 = vrot.slane %v784_v55, %v1082_v3 }
  0x4e   : > { %v633_v21 = vsel %vm377_vm5, %v631_v18, %v591_v5  ;;  %v626_v23 = vsel %vm365_vm1, %v624_v20, %v551_v14 }
  0x4f   : > { %v635_v24 = vsel %vm380_vm6, %v633_v21, %v602_v6  ;;  %v628_v26 = vsel %vm368_vm2, %v626_v23, %v562_v2 }
  0x50   : > { %639 = vst [vmem:[%s1141_s18 + $0x30] sm:$0xff] %v635_v24  ;;  %v630_v27 = vsel %vm371_vm3, %v628_v26, %v573_v17 }
  0x51   : > { %v632_v28 = vsel %vm374_vm4, %v630_v27, %v584_v19 }
  0x52   : > { %v634_v29 = vsel %vm377_vm5, %v632_v28, %v595_v22 }
  0x53   : > { %v636_v3 = vsel %vm380_vm6, %v634_v29, %v606_v25 }
  0x54   : > { %640 = vst [vmem:[%s1141_s18 + $0x38] sm:$0xff] %v636_v3 }
  0x55   : > { %899 = shalt.err (!%p896_p6)
}
  0x56   : > { %s900_s4 = scalar_lea.hbm %s1264_s9, 1024  ;;  %s904_s13 = scalar_lea.hbm %s1316_s1, 2048 }
  0x57   : > { %p901_p7 = scmp.ne.s32.totalorder %s1264_s9, %s900_s4  ;;  %p905_p13 = scmp.lt.s32.totalorder %s1264_s9, %s1316_s1 }
  0x58   : > { %p906_p2 = scmp.lt.s32.totalorder %s904_s13, %s900_s4 }
  0x59   : > { %p902_p10 = pnand %p901_p7, %p1035_p9 }
  0x5a   : > { %p907_p8 = por %p906_p2, %p905_p13 }
  0x5b   : > { %p903_p4 = pneg %p902_p10 }
  0x5d   : > { %p908_p12 = pnand %p907_p8, %p903_p4 }
  0x5f   : > { %911 = shalt.err (!%p908_p12)
}
  0x60   : > { %s972_s22 = smov 256   ;;  %s973_s23 = smov 16  }
  0x61   : > { %794 = dma.vmem_to_hbm [thread:$0]  (%p1035_p9), %s1258_s24, 1024, %s1264_s9, %s642_s28, %s972_s22, %s972_s22, %s973_s23  }
  0x62 PF: > { %s672_s18 = sand.u32 1, %s946_s6   ;;  %p1322_p0 = scmp.ge.s32.totalorder %s966_s11, 2 }
  0x63   : > { %s673_s25 = scalar_lea.sflag [#allocation4], %s672_s18 }
  0x64   : > { %p801_p1 = pnand %p1322_p0, %p1042_p11 }
  0x66   : > { %p802_p3 = pneg %p801_p1 }
  0x68   : > { %941 = dma.done.wait (%p802_p3), %s673_s25, 1024  }
  0x69   : > { %943 = vsyncadd (%p802_p3), %s673_s25, 4294966272  ;;  %s17_s11 = sadd.s32 1, %s966_s11   ;;  %s1323_s6 = smov %s950_s7 }
  0x6a   : > { %p14_p5 = scmp.ge.s32.totalorder %s17_s11, 4   ;;  %s1324_s7 = smov %s954_s8 }
  0x6b   : > { %s1325_s8 = smov %s1040_s20  ;;  %s1326_s9 = smov %s962_s10 }
  0x6c   : > { %s1327_s10 = smov %s1329_s14  ;;  %16 = sbr.rel (!%p14_p5) target bundleno = 6 (0x6), region = 100 }
  0x71   :  { %678 = vsyncpa [#allocation3], 1 }
  0x72   :  { %680 = vsyncpa [#allocation3 + $0x1], 1 }
  0x73   :  { %681 = vsyncpa [#allocation4], 1 }
  0x74   :  { %683 = vsyncpa [#allocation4 + $0x1], 1 }

</bundles_post_ra>
